<compile_context>
chip_gen: v6e
topology: v6e:2x2x1
jax: 0.10.0
libtpu: 0.0.40
codegen_flags: <defaults>
</compile_context>

<pallas_src>
import functools

import jax
import jax.numpy as jnp
import numpy as np
from jax.experimental import pallas as pl
from jax.experimental.pallas import tpu as pltpu


def _round_up(v: int, m: int) -> int:
    return ((v + m - 1) // m) * m


def _group_sum_kernel(*refs, k: int, g: int, inv_tau: float, use_mxu: bool,
                      precision=None):
    if use_mxu:
        gm_ref, x_ref, o_ref = refs
        # gm_ref: (k, n) resident 0/1 grouping matrix; x_ref: (tm, n) tile.
        # Attention-style contraction over the feature dim produces the result
        # directly in lane-dense transposed form (k, tm) on the MXU with f32
        # accumulation (exact for 0/1 weights).
        s_t = jax.lax.dot_general(
            gm_ref[...], x_ref[...],
            dimension_numbers=(((1,), (1,)), ((), ())),
            preferred_element_type=jnp.float32,
            precision=precision)                               # (k, tm) f32
    else:
        x_ref, o_ref = refs
        tm = x_ref.shape[0]
        # Exact f32 per-group lane-slice reductions (bit-faithful vs. a f32
        # reshape+sum reference), then a single tile-aligned transpose
        # (tm, kp) -> (kp, tm) so the store is lane-dense.
        cols = [jnp.sum(x_ref[:, i * g:(i + 1) * g].astype(jnp.float32),
                        axis=-1, keepdims=True)
                for i in range(k)]                             # k x (tm, 1)
        kp = _round_up(k, 128)
        if kp > k:
            cols.append(jnp.zeros((tm, kp - k), jnp.float32))  # pad to lane tile
        s = jnp.concatenate(cols, axis=-1)                     # (tm, kp) f32
        s_t = s.T[:k, :]                                       # (k, tm) f32
    o_ref[...] = (s_t * inv_tau).astype(o_ref.dtype)


def group_sum(x: jax.Array, k: int, tau: float = 1.0, *,
              tm: int | None = None) -> jax.Array:
    """Pallas implementation of GroupSum.forward for dense tensors."""
    # TODO(synk): PackBitsTensor fast path has no Pallas equivalent; dense only.
    n = x.shape[-1]
    assert n % k == 0, (x.shape, k)
    g = n // k
    lead = x.shape[:-1]
    m = int(np.prod(lead)) if lead else 1
    x2 = x.reshape(m, n)
    itemsize = x.dtype.itemsize

    is_float = jnp.issubdtype(x.dtype, jnp.floating)
    small_float = is_float and itemsize <= 2
    # Path selection: MXU grouping-matrix matmul for sub-32-bit floats (exact);
    # exact lane-slice reductions for f32/ints; MXU (HIGHEST precision) only
    # for f32 with very many groups (avoids k unrolled slices).
    use_mxu = small_float or (is_float and k > 64)
    precision = jax.lax.Precision.HIGHEST if (use_mxu and not small_float) else None
    # TODO(synk): integer inputs are summed in f32 and cast back to the int
    # dtype; torch's reshape().sum()/tau would return a floating tensor.

    # Probe VMEM capacity (v7x: 64 MiB physical; v5e/v6e: 128 MiB).
    try:
        vmem_cap = int(pltpu.get_tpu_info().vmem_capacity_bytes)
    except Exception:
        vmem_cap = 64 << 20

    # ---- row-tile selection (HBM-read bound; tm is the output lane tile) ----
    if tm is None:
        target_block_bytes = (8 << 20) if vmem_cap >= (100 << 20) else (4 << 20)
        tm = target_block_bytes // max(1, n * itemsize)
        tm = max(128, min((tm // 128) * 128, 2048))
        # Prefer >= 4 grid steps when m allows (>= 2 per TensorCore on
        # dual-core parts) so per-core DMA/compute pipelining happens.
        if m >= 4 * 128 and pl.cdiv(m, tm) < 4:
            tm = max(128, _round_up(pl.cdiv(m, 4), 128))
    else:
        tm = max(128, _round_up(int(tm), 128))
    tm = min(tm, _round_up(m, 128))
    # TODO(synk): for extremely wide feature dims, add a second 'arbitrary'
    # feature grid axis (block width a multiple of g) with accumulation,
    # instead of shrinking tm; not needed at these sizes.

    grid = (pl.cdiv(m, tm),)   # partial last block; no input pad copy

    in_specs, args = [], []
    gmat_bytes = 0
    if use_mxu:
        gdtype = x.dtype if small_float else jnp.float32
        gids = np.arange(n) // g
        gmat_t = jnp.asarray(
            (np.arange(k)[:, None] == gids[None, :]).astype(np.float32),
            dtype=gdtype)                                     # (k, n) 0/1, resident
        in_specs.append(pl.BlockSpec((k, n), lambda i: (0, 0)))
        args.append(gmat_t)
        gmat_bytes = int(gmat_t.size) * gmat_t.dtype.itemsize
    in_specs.append(pl.BlockSpec((tm, n), lambda i: (i, 0)))
    args.append(x2)

    # VMEM budget derived from actual block sizes (stays under v7x's 64 MiB).
    in_block = tm * n * itemsize
    out_block = k * tm * itemsize
    temp_bytes = (2 * tm * _round_up(k, 128) * 4) if not use_mxu \
        else (2 * tm * _round_up(k, 8) * 4)
    vmem_needed = 2 * in_block + 2 * out_block + 2 * gmat_bytes + temp_bytes + (2 << 20)
    vmem_limit = int(max(32 << 20, min(vmem_needed, 48 << 20)))

    cost = pl.CostEstimate(
        flops=(2 * m * n * k) if use_mxu else (m * n),
        transcendentals=0,
        bytes_accessed=m * n * itemsize + m * k * itemsize + gmat_bytes)

    out_t = pl.pallas_call(
        functools.partial(_group_sum_kernel, k=k, g=g, inv_tau=float(1.0 / tau),
                          use_mxu=use_mxu, precision=precision),
        out_shape=jax.ShapeDtypeStruct((k, m), x.dtype),      # transposed, lane-dense
        grid=grid,
        in_specs=in_specs,
        out_specs=pl.BlockSpec((k, tm), lambda i: (0, i)),
        compiler_params=pltpu.CompilerParams(
            dimension_semantics=("parallel",),
            vmem_limit_bytes=vmem_limit),
        cost_estimate=cost,
    )(*args)
    return out_t.T.reshape(*lead, k)


def group_sum_ref(x: jax.Array, k: int, tau: float = 1.0) -> jax.Array:
    n = x.shape[-1]
    return x.reshape(*x.shape[:-1], k, n // k).sum(-1) / tau


if __name__ == "__main__":
    # GroupSum has no learnable parameters; k and tau are hyperparameters.
    key = jax.random.PRNGKey(0)

    # 1) f32, lane-aligned groups (g = 128): exact slice-reduction path.
    k, tau = 4, 2.0
    x = jax.random.normal(key, (2, 8, 512), dtype=jnp.float32)
    y = jax.block_until_ready(group_sum(x, k=k, tau=tau))
    assert y.shape == (2, 8, k), y.shape
    np.testing.assert_allclose(np.asarray(y), np.asarray(group_sum_ref(x, k, tau)),
                               rtol=1e-5, atol=1e-5)

    # 2) Row count not a multiple of the row tile (partial block, grid = 1).
    x2 = jax.random.normal(jax.random.PRNGKey(1), (5, 384), dtype=jnp.float32)
    y2 = jax.block_until_ready(group_sum(x2, k=3, tau=1.5))
    np.testing.assert_allclose(np.asarray(y2), np.asarray(group_sum_ref(x2, 3, 1.5)),
                               rtol=1e-5, atol=1e-5)

    # 3) bf16 with unaligned group width (g = 64): resident grouping-matrix MXU path.
    x3 = jax.random.normal(jax.random.PRNGKey(2), (2, 8, 768), dtype=jnp.bfloat16)
    y3 = jax.block_until_ready(group_sum(x3, k=12, tau=1.0))
    y3_ref = group_sum_ref(x3.astype(jnp.float32), 12, 1.0)
    np.testing.assert_allclose(np.asarray(y3, dtype=np.float32), np.asarray(y3_ref),
                               rtol=2e-2, atol=1e-1)

    # 4) Multi-step grid with a partial last block (forced small row tile).
    x4 = jax.random.normal(jax.random.PRNGKey(3), (3, 200, 512), dtype=jnp.float32)
    y4 = jax.block_until_ready(group_sum(x4, k=4, tau=1.0, tm=256))
    np.testing.assert_allclose(np.asarray(y4), np.asarray(group_sum_ref(x4, 4, 1.0)),
                               rtol=1e-5, atol=1e-5)

    print("KERNEL_OK")
</pallas_src>

<mosaic_0001>
module attributes {stable_mosaic.version = 11 : i64} {
  func.func @_group_sum_kernel(%arg0: i32, %arg1: memref<128x512xf32, #tpu.memory_space<vmem>>, %arg2: memref<4x128xf32, #tpu.memory_space<vmem>>) attributes {dimension_semantics = [#tpu.dimension_semantics<parallel>], iteration_bounds = array<i64: 1>, scalar_prefetch = 0 : i64, scratch_operands = 0 : i64, tpu.core_type = #tpu.core_type<tc>, window_params = [{transform_indices = @transform_0, window_bounds = array<i64: 128, 512>}, {transform_indices = @transform_1, window_bounds = array<i64: 4, 128>}]} {
    %c0 = arith.constant 0 : index
    %c0_0 = arith.constant 0 : index
    %0 = vector.load %arg1[%c0, %c0_0] : memref<128x512xf32, #tpu.memory_space<vmem>>, vector<128x128xf32>
    %cst = arith.constant dense<0.000000e+00> : vector<128xf32>
    %1 = vector.multi_reduction <add>, %0, %cst [1] : vector<128x128xf32> to vector<128xf32>
    %2 = vector.shape_cast %1 : vector<128xf32> to vector<128x1xf32>
    %c0_1 = arith.constant 0 : index
    %c128 = arith.constant 128 : index
    %3 = vector.load %arg1[%c0_1, %c128] : memref<128x512xf32, #tpu.memory_space<vmem>>, vector<128x128xf32>
    %cst_2 = arith.constant dense<0.000000e+00> : vector<128xf32>
    %4 = vector.multi_reduction <add>, %3, %cst_2 [1] : vector<128x128xf32> to vector<128xf32>
    %5 = vector.shape_cast %4 : vector<128xf32> to vector<128x1xf32>
    %c0_3 = arith.constant 0 : index
    %c256 = arith.constant 256 : index
    %6 = vector.load %arg1[%c0_3, %c256] : memref<128x512xf32, #tpu.memory_space<vmem>>, vector<128x128xf32>
    %cst_4 = arith.constant dense<0.000000e+00> : vector<128xf32>
    %7 = vector.multi_reduction <add>, %6, %cst_4 [1] : vector<128x128xf32> to vector<128xf32>
    %8 = vector.shape_cast %7 : vector<128xf32> to vector<128x1xf32>
    %c0_5 = arith.constant 0 : index
    %c384 = arith.constant 384 : index
    %9 = vector.load %arg1[%c0_5, %c384] : memref<128x512xf32, #tpu.memory_space<vmem>>, vector<128x128xf32>
    %cst_6 = arith.constant dense<0.000000e+00> : vector<128xf32>
    %10 = vector.multi_reduction <add>, %9, %cst_6 [1] : vector<128x128xf32> to vector<128xf32>
    %11 = vector.shape_cast %10 : vector<128xf32> to vector<128x1xf32>
    %cst_7 = arith.constant 0.000000e+00 : f32
    %12 = vector.broadcast %cst_7 : f32 to vector<128x124xf32>
    %13 = tpu.concatenate %2, %5, %8, %11, %12 in 1 : vector<128x1xf32>, vector<128x1xf32>, vector<128x1xf32>, vector<128x1xf32>, vector<128x124xf32> -> vector<128x128xf32>
    %14 = tpu.transpose %13, [1, 0] : vector<128x128xf32> -> vector<128x128xf32>
    %15 = vector.extract_strided_slice %14 {offsets = [0, 0], sizes = [4, 128], strides = [1, 1]} : vector<128x128xf32> to vector<4x128xf32>
    %cst_8 = arith.constant 5.000000e-01 : f32
    %16 = vector.broadcast %cst_8 : f32 to vector<4x128xf32>
    %17 = arith.mulf %15, %16 : vector<4x128xf32>
    %c0_9 = arith.constant 0 : index
    %c0_10 = arith.constant 0 : index
    %18 = vector.load %arg2[%c0_9, %c0_10] : memref<4x128xf32, #tpu.memory_space<vmem>>, vector<4x128xf32>
    tpu.vector_store %arg2[%c0_9, %c0_10], %17 {strides = array<i32>} : memref<4x128xf32, #tpu.memory_space<vmem>>, vector<4x128xf32>,
    return
  }
  func.func @transform_0(%arg0: i32) -> (i32, i32) {
    %c0_i32 = arith.constant 0 : i32
    %c0_i32_0 = arith.constant 0 : i32
    return %arg0, %c0_i32 : i32, i32
  }
  func.func @transform_1(%arg0: i32) -> (i32, i32) {
    %c0_i32 = arith.constant 0 : i32
    %c0_i32_0 = arith.constant 0 : i32
    return %c0_i32, %arg0 : i32, i32
  }
}

</mosaic_0001>

<bundles_post_ra>
// kernel: tpu_custom_call.1
= control target key start
LH: loop header
LB: loop body
LE: loop exit
PB: predicated region body
PF: predicated region fallthrough
CT: control target
= control target key end

     0   :  { %6 = vsyncpa [#allocation3], 0  ;;  %s494_s0 = inlined_call_operand.hbm [shape: f32[16,512], index: 0, kind: input, shape index: {}]   ;;  %s495_s1 = inlined_call_operand.hbm [shape: f32[4,16], index: 1, kind: output, shape index: {}]  }
   0x1   :  { %7 = vsyncpa [#allocation4], 0 }
   0x2   :  { %12 = vsyncadd [#allocation3], 7168  ;;  %s380_s6 = smov [#allocation2]  }
   0x3   :  { %s13_s7 = sshll.u32 %s380_s6, 4  ;;  %s14_s7 = int_to_ptr.vmem [resolvable:$true] %s13_s7 }
   0x4   :  { %s344_s8 = scalar_lea.vmem %s14_s7, 1024  ;;  %s348_s9 = scalar_lea.vmem %s14_s7, 8192 }
   0x5   :  { %p345_p0 = scmp.ne.s32.totalorder %s14_s7, %s344_s8  ;;  %p349_p1 = scmp.lt.s32.totalorder %s14_s7, %s14_s7 }
   0x6   :  { %p350_p2 = scmp.lt.s32.totalorder %s348_s9, %s344_s8 }
   0x8   :  { %p351_p3 = por %p350_p2, %p349_p1 }
   0xa   :  { %p352_p4 = pnand %p351_p3, %p345_p0 }
   0xc   :  { %355 = shalt.err (!%p352_p4)
}
   0xd   :  { %s381_s10 = smov 512   ;;  %s382_s11 = smov 32  }
   0xe   :  { %19 = dma.hbm_to_vmem [thread:$0]  %s494_s0, 1024, %s14_s7, [#allocation3], %s381_s10, %s381_s10, %s382_s11  }
   0xf   :  { %376 = dma.done.wait [#allocation3], 8192  }
  0x10   :  { %377 = vsyncadd [#allocation3], 4294959104  ;;  %v25_v0 = vld [vmem:[#allocation2 + $0x40] sm:$0xff]  ;;  %v72_v16 = vld [vmem:[#allocation2 + $0x28] sm:$0xff]  ;;  %vm215_vm0 = vcmask 7168   ;;  %vm232_vm1 = vcmask 15360  }
  0x11   :  { %v23_v1 = vld [vmem:[#allocation2] sm:$0xff]  ;;  %43 = vadd.xlane.f32.xlu1 %v25_v0  ;;  %v71_v17 = vld [vmem:[#allocation2 + $0x8] sm:$0xff]  ;;  %v119_v20 = vld [vmem:[#allocation2 + $0x10] sm:$0xff]  ;;  %vm249_vm2 = vcmask 23552   ;;  %vm266_vm3 = vcmask 31744   ;;  %s383_s0 = smov [#allocation5]  }
  0x12   :  { %39 = vadd.xlane.f32.xlu0 %v23_v1  ;;  %v26_v2 = vld [vmem:[#allocation2 + $0x60] sm:$0xff]  ;;  %v74_v18 = vld [vmem:[#allocation2 + $0x68] sm:$0xff]  ;;  %v120_v22 = vld [vmem:[#allocation2 + $0x30] sm:$0xff]  ;;  %s323_s14 = sshll.u32 %s383_s0, 4  ;;  %s324_s14 = int_to_ptr.vmem [resolvable:$true] %s323_s14 }
  0x13   :  { %v24_v3 = vld [vmem:[#allocation2 + $0x20] sm:$0xff]  ;;  %v73_v19 = vld [vmem:[#allocation2 + $0x48] sm:$0xff]  ;;  %v167_v23 = vld [vmem:[#allocation2 + $0x18] sm:$0xff]  ;;  %s356_s15 = scalar_lea.vmem %s324_s14, 64  ;;  %p361_p6 = scmp.lt.s32.totalorder %s324_s14, %s324_s14 }
  0x14   :  { %v28_v4 = vld [vmem:[#allocation2 + $0xa0] sm:$0xff]  ;;  %v75_v21 = vld [vmem:[#allocation2 + $0x88] sm:$0xff]  ;;  %v121_v24 = vld [vmem:[#allocation2 + $0x50] sm:$0xff]  ;;  %p357_p5 = scmp.ne.s32.totalorder %s324_s14, %s356_s15  ;;  %p362_p7 = scmp.lt.s32.totalorder %s356_s15, %s356_s15 }
  0x15   :  { %45 = vadd.xlane.f32.xlu1 %v26_v2  ;;  %v27_v5 = vld [vmem:[#allocation2 + $0x80] sm:$0xff]  ;;  %v168_v25 = vld [vmem:[#allocation2 + $0x38] sm:$0xff]  ;;  %v122_v26 = vld [vmem:[#allocation2 + $0x70] sm:$0xff] }
  0x16   :  { %41 = vadd.xlane.f32.xlu0 %v24_v3  ;;  %v30_v6 = vld [vmem:[#allocation2 + $0xe0] sm:$0xff]  ;;  %v169_v27 = vld [vmem:[#allocation2 + $0x58] sm:$0xff]  ;;  %v123_v28 = vld [vmem:[#allocation2 + $0x90] sm:$0xff]  ;;  %p363_p8 = por %p362_p7, %p361_p6 }
  0x17   :  { %v29_v7 = vld [vmem:[#allocation2 + $0xc0] sm:$0xff]  ;;  %v170_v29 = vld [vmem:[#allocation2 + $0x78] sm:$0xff]  ;;  %v76_v31 = vld [vmem:[#allocation2 + $0xa8] sm:$0xff] }
  0x18   :  { %v32_v8 = vld [vmem:[#allocation2 + $0x120] sm:$0xff]  ;;  %v171_v30 = vld [vmem:[#allocation2 + $0x98] sm:$0xff]  ;;  %v77_v32 = vld [vmem:[#allocation2 + $0xc8] sm:$0xff]  ;;  %p364_p9 = pnand %p363_p8, %p357_p5 }
  0x19   :  { %49 = vadd.xlane.f32.xlu1 %v28_v4  ;;  %v31_v9 = vld [vmem:[#allocation2 + $0x100] sm:$0xff]  ;;  %v124_v33 = vld [vmem:[#allocation2 + $0xb0] sm:$0xff]  ;;  %v172_v35 = vld [vmem:[#allocation2 + $0xb8] sm:$0xff] }
  0x1a   :  { %47 = vadd.xlane.f32.xlu0 %v27_v5  ;;  %v34_v10 = vld [vmem:[#allocation2 + $0x160] sm:$0xff]  ;;  %v125_v34 = vld [vmem:[#allocation2 + $0xd0] sm:$0xff]  ;;  %v173_v36 = vld [vmem:[#allocation2 + $0xd8] sm:$0xff] }
  0x1b   :  { %v33_v11 = vld [vmem:[#allocation2 + $0x140] sm:$0xff]  ;;  %v78_v37 = vld [vmem:[#allocation2 + $0xe8] sm:$0xff]  ;;  %v126_v39 = vld [vmem:[#allocation2 + $0xf0] sm:$0xff] }
  0x1c   :  { %v36_v12 = vld [vmem:[#allocation2 + $0x1a0] sm:$0xff]  ;;  %v79_v38 = vld [vmem:[#allocation2 + $0x108] sm:$0xff]  ;;  %v127_v40 = vld [vmem:[#allocation2 + $0x110] sm:$0xff] }
  0x1d   :  { %53 = vadd.xlane.f32.xlu1 %v30_v6  ;;  %v35_v13 = vld [vmem:[#allocation2 + $0x180] sm:$0xff]  ;;  %v174_v41 = vld [vmem:[#allocation2 + $0xf8] sm:$0xff]  ;;  %v80_v43 = vld [vmem:[#allocation2 + $0x128] sm:$0xff] }
  0x1e   :  { %51 = vadd.xlane.f32.xlu0 %v29_v7  ;;  %v38_v14 = vld [vmem:[#allocation2 + $0x1e0] sm:$0xff]  ;;  %v175_v42 = vld [vmem:[#allocation2 + $0x118] sm:$0xff]  ;;  %v81_v44 = vld [vmem:[#allocation2 + $0x148] sm:$0xff] }
  0x1f   :  { %v37_v15 = vld [vmem:[#allocation2 + $0x1c0] sm:$0xff]  ;;  %v128_v45 = vld [vmem:[#allocation2 + $0x130] sm:$0xff]  ;;  %v176_v47 = vld [vmem:[#allocation2 + $0x138] sm:$0xff] }
  0x20   :  { %v129_v46 = vld [vmem:[#allocation2 + $0x150] sm:$0xff]  ;;  %v177_v48 = vld [vmem:[#allocation2 + $0x158] sm:$0xff]  ;;  %v82_v49 = vld [vmem:[#allocation2 + $0x168] sm:$0xff] }
  0x21   :  { %57 = vadd.xlane.f32.xlu1 %v32_v8  ;;  %v83_v50 = vld [vmem:[#allocation2 + $0x188] sm:$0xff]  ;;  %v130_v51 = vld [vmem:[#allocation2 + $0x170] sm:$0xff]  ;;  %v178_v53 = vld [vmem:[#allocation2 + $0x178] sm:$0xff] }
  0x22   :  { %55 = vadd.xlane.f32.xlu0 %v31_v9  ;;  %v131_v52 = vld [vmem:[#allocation2 + $0x190] sm:$0xff]  ;;  %v179_v54 = vld [vmem:[#allocation2 + $0x198] sm:$0xff]  ;;  %v84_v55 = vld [vmem:[#allocation2 + $0x1a8] sm:$0xff] }
  0x23   :  { %v85_v56 = vld [vmem:[#allocation2 + $0x1c8] sm:$0xff]  ;;  %v132_v57 = vld [vmem:[#allocation2 + $0x1b0] sm:$0xff]  ;;  %v180_v59 = vld [vmem:[#allocation2 + $0x1b8] sm:$0xff] }
  0x24   :  { %v133_v58 = vld [vmem:[#allocation2 + $0x1d0] sm:$0xff]  ;;  %v181_v60 = vld [vmem:[#allocation2 + $0x1d8] sm:$0xff]  ;;  %v86_v61 = vld [vmem:[#allocation2 + $0x1e8] sm:$0xff] }
  0x25   :  { %61 = vadd.xlane.f32.xlu1 %v34_v10  ;;  %v134_v62 = vld [vmem:[#allocation2 + $0x1f0] sm:$0xff]  ;;  %v182_v63 = vld [vmem:[#allocation2 + $0x1f8] sm:$0xff] }
  0x26   :  { %59 = vadd.xlane.f32.xlu0 %v33_v11 }
  0x29   :  { %65 = vadd.xlane.f32.xlu1 %v36_v12 }
  0x2a   :  { %63 = vadd.xlane.f32.xlu0 %v35_v13 }
  0x2d   :  { %69 = vadd.xlane.f32.xlu1 %v38_v14 }
  0x2e   :  { %67 = vadd.xlane.f32.xlu0 %v37_v15 }
  0x31   :  { %89 = vadd.xlane.f32.xlu1 %v72_v16 }
  0x32   :  { %87 = vadd.xlane.f32.xlu0 %v71_v17 }
  0x35   :  { %93 = vadd.xlane.f32.xlu1 %v74_v18 }
  0x36   :  { %91 = vadd.xlane.f32.xlu0 %v73_v19 }
  0x39   :  { %135 = vadd.xlane.f32.xlu1 %v119_v20 }
  0x3a   :  { %95 = vadd.xlane.f32.xlu0 %v75_v21 }
  0x3d   :  { %137 = vadd.xlane.f32.xlu1 %v120_v22 }
  0x3e   :  { %183 = vadd.xlane.f32.xlu0 %v167_v23 }
  0x41   :  { %139 = vadd.xlane.f32.xlu1 %v121_v24 }
  0x42   :  { %185 = vadd.xlane.f32.xlu0 %v168_v25 }
  0x45   :  { %141 = vadd.xlane.f32.xlu1 %v122_v26 }
  0x46   :  { %187 = vadd.xlane.f32.xlu0 %v169_v27 }
  0x49   :  { %143 = vadd.xlane.f32.xlu1 %v123_v28 }
  0x4a   :  { %189 = vadd.xlane.f32.xlu0 %v170_v29 }
  0x4d   :  { %191 = vadd.xlane.f32.xlu1 %v171_v30 }
  0x4e   :  { %97 = vadd.xlane.f32.xlu0 %v76_v31 }
  0x51   :  { %99 = vadd.xlane.f32.xlu1 %v77_v32 }
  0x52   :  { %145 = vadd.xlane.f32.xlu0 %v124_v33 }
  0x55   :  { %147 = vadd.xlane.f32.xlu1 %v125_v34 }
  0x56   :  { %193 = vadd.xlane.f32.xlu0 %v172_v35 }
  0x59   :  { %195 = vadd.xlane.f32.xlu1 %v173_v36 }
  0x5a   :  { %101 = vadd.xlane.f32.xlu0 %v78_v37 }
  0x5d   :  { %103 = vadd.xlane.f32.xlu1 %v79_v38 }
  0x5e   :  { %149 = vadd.xlane.f32.xlu0 %v126_v39 }
  0x61   :  { %151 = vadd.xlane.f32.xlu1 %v127_v40 }
  0x62   :  { %197 = vadd.xlane.f32.xlu0 %v174_v41 }
  0x65   :  { %199 = vadd.xlane.f32.xlu1 %v175_v42 }
  0x66   :  { %105 = vadd.xlane.f32.xlu0 %v80_v43 }
  0x69   :  { %107 = vadd.xlane.f32.xlu1 %v81_v44 }
  0x6a   :  { %153 = vadd.xlane.f32.xlu0 %v128_v45 }
  0x6d   :  { %155 = vadd.xlane.f32.xlu1 %v129_v46 }
  0x6e   :  { %201 = vadd.xlane.f32.xlu0 %v176_v47 }
  0x71   :  { %203 = vadd.xlane.f32.xlu1 %v177_v48 }
  0x72   :  { %109 = vadd.xlane.f32.xlu0 %v82_v49 }
  0x75   :  { %111 = vadd.xlane.f32.xlu1 %v83_v50 }
  0x76   :  { %157 = vadd.xlane.f32.xlu0 %v130_v51 }
  0x79   :  { %159 = vadd.xlane.f32.xlu1 %v131_v52 }
  0x7a   :  { %205 = vadd.xlane.f32.xlu0 %v178_v53 }
  0x7d   :  { %207 = vadd.xlane.f32.xlu1 %v179_v54 }
  0x7e   :  { %113 = vadd.xlane.f32.xlu0 %v84_v55 }
  0x81   :  { %115 = vadd.xlane.f32.xlu1 %v85_v56 }
  0x82   :  { %161 = vadd.xlane.f32.xlu0 %v132_v57 }
  0x85   :  { %163 = vadd.xlane.f32.xlu1 %v133_v58 }
  0x86   :  { %209 = vadd.xlane.f32.xlu0 %v180_v59 }
  0x89   :  { %211 = vadd.xlane.f32.xlu1 %v181_v60 }
  0x8a   :  { %117 = vadd.xlane.f32.xlu0 %v86_v61 }
  0x8d   :  { %213 = vadd.xlane.f32.xlu1 %v182_v63 }
  0x8e   :  { %165 = vadd.xlane.f32.xlu0 %v134_v62 }
  0x9a   :  { %v44_v0 = vpop.xlane.xlu1 %43 }
  0x9b   :  { %v40_v1 = vpop.xlane.xlu0 %39 }
  0x9e   :  { %v46_v2 = vpop.xlane.xlu1 %45 }
  0x9f   :  { %v42_v3 = vpop.xlane.xlu0 %41 }
  0xa2   :  { %v50_v4 = vpop.xlane.xlu1 %49 }
  0xa3   :  { %v48_v5 = vpop.xlane.xlu0 %47 }
  0xa6   :  { %v397_v6 = vpop.xlane.xlu1 %53 }
  0xa7   :  { %v399_v7 = vpop.xlane.xlu0 %51 }
  0xaa   :  { %v401_v8 = vpop.xlane.xlu1 %57 }
  0xab   :  { %v403_v9 = vpop.xlane.xlu0 %55 }
  0xae   :  { %v405_v10 = vpop.xlane.xlu1 %61 }
  0xaf   :  { %v407_v11 = vpop.xlane.xlu0 %59 }
  0xb2   :  { %v409_v12 = vpop.xlane.xlu1 %65 }
  0xb3   :  { %v411_v13 = vpop.xlane.xlu0 %63 }
  0xb6   :  { %v413_v14 = vpop.xlane.xlu1 %69 }
  0xb7   :  { %v415_v15 = vpop.xlane.xlu0 %67 }
  0xba   :  { %v90_v16 = vpop.xlane.xlu1 %89 }
  0xbb   :  { %v88_v17 = vpop.xlane.xlu0 %87  ;;  %v217_v28 = vsel %vm215_vm0, %v42_v3, %v90_v16 }
  0xbc   :  { %v216_v22 = vsel %vm215_vm0, %v40_v1, %v88_v17 }
  0xbe   :  { %v94_v18 = vpop.xlane.xlu1 %93 }
  0xbf   :  { %v92_v19 = vpop.xlane.xlu0 %91  ;;  %v219_v40 = vsel %vm215_vm0, %v46_v2, %v94_v18 }
  0xc0   :  { %v218_v34 = vsel %vm215_vm0, %v44_v0, %v92_v19 }
  0xc2   :  { %v136_v20 = vpop.xlane.xlu1 %135 }
  0xc3   :  { %v96_v21 = vpop.xlane.xlu0 %95  ;;  %v233_v23 = vsel %vm232_vm1, %v216_v22, %v136_v20 }
  0xc4   :  { %v220_v46 = vsel %vm215_vm0, %v48_v5, %v96_v21 }
  0xc6   :  { %v138_v24 = vpop.xlane.xlu1 %137 }
  0xc7   :  { %v184_v25 = vpop.xlane.xlu0 %183  ;;  %v234_v29 = vsel %vm232_vm1, %v217_v28, %v138_v24 }
  0xc8   :  { %v250_v26 = vsel %vm249_vm2, %v233_v23, %v184_v25 }
  0xc9   :  { %v267_v27 = vsel %vm266_vm3, %v250_v26, 0.0 }
  0xca   :  { %283 = vxpose.xlu0.b32.start [1/16] (narrow) %v267_v27, 8  ;;  %v140_v30 = vpop.xlane.xlu1 %139 }
  0xcb   :  { %v186_v31 = vpop.xlane.xlu0 %185  ;;  %v235_v35 = vsel %vm232_vm1, %v218_v34, %v140_v30 }
  0xcc   :  { %v251_v32 = vsel %vm249_vm2, %v234_v29, %v186_v31 }
  0xcd   :  { %v268_v33 = vsel %vm266_vm3, %v251_v32, 0.0 }
  0xce   :  { %284 = vxpose.xlu0.b32.cont [2/16] (narrow) %v268_v33, 8  ;;  %v142_v36 = vpop.xlane.xlu1 %141 }
  0xcf   :  { %v188_v37 = vpop.xlane.xlu0 %187  ;;  %v236_v41 = vsel %vm232_vm1, %v219_v40, %v142_v36 }
  0xd0   :  { %v252_v38 = vsel %vm249_vm2, %v235_v35, %v188_v37 }
  0xd1   :  { %v269_v39 = vsel %vm266_vm3, %v252_v38, 0.0 }
  0xd2   :  { %285 = vxpose.xlu0.b32.cont [3/16] (narrow) %v269_v39, 8  ;;  %v144_v42 = vpop.xlane.xlu1 %143 }
  0xd3   :  { %v190_v43 = vpop.xlane.xlu0 %189  ;;  %v237_v47 = vsel %vm232_vm1, %v220_v46, %v144_v42 }
  0xd4   :  { %v253_v44 = vsel %vm249_vm2, %v236_v41, %v190_v43 }
  0xd5   :  { %v270_v45 = vsel %vm266_vm3, %v253_v44, 0.0 }
  0xd6   :  { %286 = vxpose.xlu0.b32.cont [4/16] (narrow) %v270_v45, 8  ;;  %v192_v48 = vpop.xlane.xlu1 %191 }
  0xd7   :  { %v98_v49 = vpop.xlane.xlu0 %97  ;;  %v254_v50 = vsel %vm249_vm2, %v237_v47, %v192_v48 }
  0xd8   :  { %v271_v51 = vsel %vm266_vm3, %v254_v50, 0.0  ;;  %v221_v54 = vsel %vm215_vm0, %v50_v4, %v98_v49 }
  0xda   :  { %287 = vxpose.xlu0.b32.cont [5/16] (narrow) %v271_v51, 8  ;;  %v100_v52 = vpop.xlane.xlu1 %99 }
  0xdb   :  { %v146_v53 = vpop.xlane.xlu0 %145  ;;  %v222_v60 = vsel %vm215_vm0, %v399_v7, %v100_v52 }
  0xdc   :  { %v238_v55 = vsel %vm232_vm1, %v221_v54, %v146_v53 }
  0xde   :  { %v148_v56 = vpop.xlane.xlu1 %147 }
  0xdf   :  { %v194_v57 = vpop.xlane.xlu0 %193  ;;  %v239_v61 = vsel %vm232_vm1, %v222_v60, %v148_v56 }
  0xe0   :  { %v255_v58 = vsel %vm249_vm2, %v238_v55, %v194_v57 }
  0xe1   :  { %v272_v59 = vsel %vm266_vm3, %v255_v58, 0.0 }
  0xe2   :  { %288 = vxpose.xlu0.b32.cont [6/16] (narrow) %v272_v59, 8  ;;  %v196_v62 = vpop.xlane.xlu1 %195 }
  0xe3   :  { %v102_v63 = vpop.xlane.xlu0 %101  ;;  %v256_v0 = vsel %vm249_vm2, %v239_v61, %v196_v62 }
  0xe4   :  { %v273_v1 = vsel %vm266_vm3, %v256_v0, 0.0  ;;  %v223_v4 = vsel %vm215_vm0, %v397_v6, %v102_v63 }
  0xe6   :  { %289 = vxpose.xlu0.b32.cont [7/16] (narrow) %v273_v1, 8  ;;  %v104_v2 = vpop.xlane.xlu1 %103 }
  0xe7   :  { %v150_v3 = vpop.xlane.xlu0 %149  ;;  %v224_v19 = vsel %vm215_vm0, %v403_v9, %v104_v2 }
  0xe8   :  { %v240_v5 = vsel %vm232_vm1, %v223_v4, %v150_v3 }
  0xea   :  { %v152_v16 = vpop.xlane.xlu1 %151 }
  0xeb   :  { %v198_v17 = vpop.xlane.xlu0 %197  ;;  %v241_v20 = vsel %vm232_vm1, %v224_v19, %v152_v16 }
  0xec   :  { %v257_v7 = vsel %vm249_vm2, %v240_v5, %v198_v17 }
  0xed   :  { %v274_v18 = vsel %vm266_vm3, %v257_v7, 0.0 }
  0xee   :  { %290 = vxpose.xlu0.b32.cont [8/16] (narrow) %v274_v18, 8  ;;  %v200_v21 = vpop.xlane.xlu1 %199 }
  0xef   :  { %v106_v22 = vpop.xlane.xlu0 %105  ;;  %v258_v23 = vsel %vm249_vm2, %v241_v20, %v200_v21 }
  0xf0   :  { %v275_v6 = vsel %vm266_vm3, %v258_v23, 0.0  ;;  %v225_v26 = vsel %vm215_vm0, %v401_v8, %v106_v22 }
  0xf2   :  { %291 = vxpose.xlu0.b32.cont [9/16] (narrow) %v275_v6, 8  ;;  %v108_v24 = vpop.xlane.xlu1 %107 }
  0xf3   :  { %v154_v25 = vpop.xlane.xlu0 %153  ;;  %v226_v31 = vsel %vm215_vm0, %v407_v11, %v108_v24 }
  0xf4   :  { %v242_v27 = vsel %vm232_vm1, %v225_v26, %v154_v25 }
  0xf6   :  { %v156_v28 = vpop.xlane.xlu1 %155 }
  0xf7   :  { %v202_v29 = vpop.xlane.xlu0 %201  ;;  %v243_v32 = vsel %vm232_vm1, %v226_v31, %v156_v28 }
  0xf8   :  { %v259_v9 = vsel %vm249_vm2, %v242_v27, %v202_v29 }
  0xf9   :  { %v276_v30 = vsel %vm266_vm3, %v259_v9, 0.0 }
  0xfa   :  { %292 = vxpose.xlu0.b32.cont [10/16] (narrow) %v276_v30, 8  ;;  %v204_v33 = vpop.xlane.xlu1 %203 }
  0xfb   :  { %v110_v34 = vpop.xlane.xlu0 %109  ;;  %v260_v35 = vsel %vm249_vm2, %v243_v32, %v204_v33 }
  0xfc   :  { %v277_v8 = vsel %vm266_vm3, %v260_v35, 0.0  ;;  %v227_v38 = vsel %vm215_vm0, %v405_v10, %v110_v34 }
  0xfe   :  { %293 = vxpose.xlu0.b32.cont [11/16] (narrow) %v277_v8, 8  ;;  %v112_v36 = vpop.xlane.xlu1 %111 }
  0xff   :  { %v158_v37 = vpop.xlane.xlu0 %157  ;;  %v228_v43 = vsel %vm215_vm0, %v411_v13, %v112_v36 }
 0x100   :  { %v244_v39 = vsel %vm232_vm1, %v227_v38, %v158_v37 }
 0x102   :  { %v160_v40 = vpop.xlane.xlu1 %159 }
 0x103   :  { %v206_v41 = vpop.xlane.xlu0 %205  ;;  %v245_v44 = vsel %vm232_vm1, %v228_v43, %v160_v40 }
 0x104   :  { %v261_v11 = vsel %vm249_vm2, %v244_v39, %v206_v41 }
 0x105   :  { %v278_v42 = vsel %vm266_vm3, %v261_v11, 0.0 }
 0x106   :  { %294 = vxpose.xlu0.b32.cont [12/16] (narrow) %v278_v42, 8  ;;  %v208_v45 = vpop.xlane.xlu1 %207 }
 0x107   :  { %v114_v46 = vpop.xlane.xlu0 %113  ;;  %v262_v47 = vsel %vm249_vm2, %v245_v44, %v208_v45 }
 0x108   :  { %v279_v10 = vsel %vm266_vm3, %v262_v47, 0.0  ;;  %v229_v50 = vsel %vm215_vm0, %v409_v12, %v114_v46 }
 0x10a   :  { %295 = vxpose.xlu0.b32.cont [13/16] (narrow) %v279_v10, 8  ;;  %v116_v48 = vpop.xlane.xlu1 %115 }
 0x10b   :  { %v162_v49 = vpop.xlane.xlu0 %161  ;;  %v230_v55 = vsel %vm215_vm0, %v415_v15, %v116_v48 }
 0x10c   :  { %v246_v51 = vsel %vm232_vm1, %v229_v50, %v162_v49 }
 0x10e   :  { %v164_v52 = vpop.xlane.xlu1 %163 }
 0x10f   :  { %v210_v53 = vpop.xlane.xlu0 %209  ;;  %v247_v56 = vsel %vm232_vm1, %v230_v55, %v164_v52 }
 0x110   :  { %v263_v13 = vsel %vm249_vm2, %v246_v51, %v210_v53 }
 0x111   :  { %v280_v54 = vsel %vm266_vm3, %v263_v13, 0.0 }
 0x112   :  { %296 = vxpose.xlu0.b32.cont [14/16] (narrow) %v280_v54, 8  ;;  %v212_v57 = vpop.xlane.xlu1 %211 }
 0x113   :  { %v118_v58 = vpop.xlane.xlu0 %117  ;;  %v264_v59 = vsel %vm249_vm2, %v247_v56, %v212_v57 }
 0x114   :  { %v281_v12 = vsel %vm266_vm3, %v264_v59, 0.0  ;;  %v231_v60 = vsel %vm215_vm0, %v413_v14, %v118_v58 }
 0x116   :  { %297 = vxpose.xlu0.b32.cont [15/16] (narrow) %v281_v12, 8  ;;  %v214_v62 = vpop.xlane.xlu1 %213 }
 0x117   :  { %v166_v61 = vpop.xlane.xlu0 %165 }
 0x118   :  { %v248_v63 = vsel %vm232_vm1, %v231_v60, %v166_v61 }
 0x119   :  { %v265_v0 = vsel %vm249_vm2, %v248_v63, %v214_v62 }
 0x11a   :  { %v282_v15 = vsel %vm266_vm3, %v265_v0, 0.0 }
 0x11b   :  { %298 = vxpose.xlu0.b32.end [16/16] (narrow) %v282_v15, 8 }
 0x15b   :  { %v299_v1 = vpop.trf.xlu0 }
 0x15c   :  { %v315_v2 = vmul.f32 0.5, %v299_v1 }
 0x15e   :  { %316 = vst [vmem:[#allocation5] sm:$0xf] %v315_v2 }
 0x15f   :  { %367 = shalt.err (!%p364_p9)
}
 0x160   :  { %326 = dma.vmem_to_hbm [thread:$0]  %s324_s14, 64, %s495_s1, [#allocation4]  }
 0x161   :  { %378 = dma.done.wait [#allocation4], 64  }
 0x162   :  { %379 = vsyncadd [#allocation4], 4294967232 }
 0x163   :  { %330 = vsyncpa [#allocation3], 1 }
 0x164   :  { %331 = vsyncpa [#allocation4], 1 }

</bundles_post_ra>
